<compile_context>
chip_gen: v7x
topology: tpu7x:2x2x1
jax: 0.10.0
libtpu: 0.0.40
codegen_flags: <defaults>
</compile_context>

<pallas_src>
import functools

import jax
import jax.numpy as jnp
import numpy as np
from jax.experimental import pallas as pl
from jax.experimental.pallas import tpu as pltpu

IGNORE_INDEX = -100
_V_TILE_MAX = 8192        # vocab lanes per block (multiple of 128)
_R_TILE_CAP = 1024        # hard cap on rows per block
_MIB = 1024 * 1024


def _round_up(x, m):
    return (x + m - 1) // m * m


def _device_info():
    """Best-effort (vmem_capacity_bytes, multi_tensorcore) query."""
    vmem_cap = None
    try:
        info = pltpu.get_tpu_info()
        vmem_cap = int(getattr(info, "vmem_capacity_bytes"))
    except Exception:
        vmem_cap = None
    kind = ""
    try:
        kind = jax.devices()[0].device_kind.lower()
    except Exception:
        pass
    if vmem_cap is None:
        if "v2" in kind or "v3" in kind:
            vmem_cap = 16 * _MIB
        else:
            vmem_cap = 64 * _MIB      # conservative default (v7x-safe)
    # Single-TensorCore chips: v5e / v6e.  Everything else (v4/v5p megacore,
    # v7x 2-TC) benefits from >= 2 parallel row blocks.
    single_tc = any(s in kind for s in ("v5 lite", "v5e", "v6 lite", "v6e"))
    return vmem_cap, not single_tc


def _nll_kernel(tgt_ref, pred_ref, nll_ref, m_ref, s_ref, t_ref,
                *, vocab_size, mask_tail):
    """Online-LSE cross entropy: one (row-tile x vocab-tile) chunk per call."""
    k = pl.program_id(1)
    last_k = pl.num_programs(1) - 1
    v_tile = pred_ref.shape[-1]

    @pl.when(k == 0)
    def _init():
        m_ref[...] = jnp.full(m_ref.shape, -jnp.inf, dtype=jnp.float32)
        s_ref[...] = jnp.zeros(s_ref.shape, dtype=jnp.float32)
        t_ref[...] = jnp.zeros(t_ref.shape, dtype=jnp.float32)

    # Column index within this vocab tile; the tile offset is applied to the
    # small (rt, 1) target column, not the full (rt, vt) iota.
    col = jax.lax.broadcasted_iota(jnp.int32, pred_ref.shape, 1)
    tgt_rel = tgt_ref[...] - k * v_tile          # (rt, 1); -100 never matches

    def accumulate(chunk):
        # max and target-logit gather are exact in the native dtype; only the
        # (rt, 1) reductions are carried in f32 (avoids materializing a full
        # (rt, vt) f32 copy of the tile with multiple consumers).
        local_max = jnp.max(chunk, axis=-1, keepdims=True).astype(jnp.float32)
        t_add = jnp.sum(
            jnp.where(col == tgt_rel, chunk, jnp.zeros((), chunk.dtype)),
            axis=-1, keepdims=True).astype(jnp.float32)
        m_prev = m_ref[...]
        m_new = jnp.maximum(m_prev, local_max)
        s_ref[...] = (s_ref[...] * jnp.exp(m_prev - m_new)
                      + jnp.sum(jnp.exp(chunk.astype(jnp.float32) - m_new),
                                axis=-1, keepdims=True))
        t_ref[...] = t_ref[...] + t_add
        m_ref[...] = m_new

    if mask_tail:
        # Only the last vocab tile has an out-of-vocab tail: interior tiles
        # skip the compare+select entirely (pure VALU saving on v7x / bf16).
        @pl.when(k == last_k)
        def _tail_tile():
            valid = vocab_size - k * v_tile
            accumulate(jnp.where(col < valid, pred_ref[...],
                                 jnp.asarray(-jnp.inf, dtype=pred_ref.dtype)))

        @pl.when(k != last_k)
        def _interior_tile():
            accumulate(pred_ref[...])
    else:
        accumulate(pred_ref[...])

    @pl.when(k == last_k)
    def _finalize():
        # NOTE: rows past n_rows in a partial last row-block are computed on
        # padded garbage; their writeback is dropped by Pallas and the
        # wrapper never reads them.
        nll_ref[...] = (m_ref[...] + jnp.log(s_ref[...])) - t_ref[...]


def _per_position_nll(tgt_tokens, pred):
    """Pallas launcher.

    tgt_tokens: (bsz, L) int32 with -100 for ignored positions
    pred:       (bsz, L, V) float32 or bfloat16 logits (native dtype)
    returns:    (bsz, L) float32 raw per-position NLL (unmasked)
    """
    bsz, L = tgt_tokens.shape
    V = pred.shape[-1]
    n_rows = bsz * L

    # Free reshapes only -- no pad, no dtype cast of the big logits tensor.
    tgt_flat = tgt_tokens.reshape(n_rows, 1).astype(jnp.int32)
    pred_flat = pred.reshape(n_rows, V)
    itemsize = pred_flat.dtype.itemsize

    vmem_cap, multi_core = _device_info()
    if vmem_cap >= 96 * _MIB:          # v5e / v6e / v5p: 128 MiB physical VMEM
        vmem_limit, block_target = 100 * _MIB, 32 * _MIB
    elif vmem_cap >= 48 * _MIB:        # v7x: 64 MiB physical VMEM per TC
        vmem_limit, block_target = 46 * _MIB, 16 * _MIB
    else:                              # v2 / v3: ~16 MiB
        vmem_limit = max(8 * _MIB, vmem_cap * 3 // 4)
        block_target = max(1 * _MIB, vmem_limit // 3)

    # Vocab tile: whole vocab when small (block == full dim, no masking),
    # else an 8192-lane chunk; the online LSE handles the reduction.
    v_tile = V if V <= _V_TILE_MAX else _V_TILE_MAX
    mask_tail = (V > _V_TILE_MAX) and (V % v_tile != 0)

    # Row tile: sized so one pred block hits the per-generation byte target
    # (amortizes the ~0.35us per-grid-step overhead), multiple of 16 for bf16
    # sublane packing, clamped to the problem.
    r_tile = block_target // (v_tile * itemsize)
    r_tile = max(16, min(_R_TILE_CAP, (r_tile // 16) * 16))
    r_tile = min(r_tile, _round_up(n_rows, 16))
    if multi_core and n_rows > 16:
        # Split small problems into >= 2 row blocks so both TCs get work.
        r_tile = min(r_tile, max(16, _round_up(pl.cdiv(n_rows, 2), 16)))
    num_i = pl.cdiv(n_rows, r_tile)
    if multi_core and num_i > 1 and num_i % 2 == 1:
        # Prefer an even block count so neither TC idles on the tail block.
        r_tile = max(16, _round_up(pl.cdiv(n_rows, num_i + 1), 16))
        num_i = pl.cdiv(n_rows, r_tile)
    num_k = pl.cdiv(V, v_tile)

    cost = pl.CostEstimate(
        flops=int(5 * n_rows * V),
        transcendentals=int(n_rows * V),
        bytes_accessed=int(n_rows * V * itemsize + 8 * n_rows))

    nll = pl.pallas_call(
        functools.partial(_nll_kernel, vocab_size=V, mask_tail=mask_tail),
        out_shape=jax.ShapeDtypeStruct((n_rows, 1), jnp.float32),
        grid_spec=pltpu.PrefetchScalarGridSpec(
            num_scalar_prefetch=0,
            grid=(num_i, num_k),
            in_specs=[
                pl.BlockSpec((r_tile, 1), lambda i, k: (i, 0)),
                pl.BlockSpec((r_tile, v_tile), lambda i, k: (i, k)),
            ],
            out_specs=pl.BlockSpec((r_tile, 1), lambda i, k: (i, 0)),
            scratch_shapes=[pltpu.VMEM((r_tile, 1), jnp.float32)] * 3,
        ),
        compiler_params=pltpu.CompilerParams(
            dimension_semantics=("parallel", "arbitrary"),
            vmem_limit_bytes=int(vmem_limit)),
        cost_estimate=cost,
    )(tgt_flat, pred_flat)

    return nll[:, 0].reshape(bsz, L)


def seq2set_loss(tgt_tokens, pred, branch_nums):
    """Pallas-backed equivalent of Seq2SetLoss.forward.

    tgt_tokens: (bsz, L) int32 with -100 for ignored positions
    pred:       (bsz, L, V) float32 or bfloat16 logits
    branch_nums: static Python list of ints summing to bsz
    Returns (loss scalar, list of per-branch sequence-probability arrays).
    """
    nll = _per_position_nll(tgt_tokens, pred)                  # (bsz, L)
    mask = tgt_tokens != IGNORE_INDEX
    counts = jnp.sum(mask, axis=1).astype(jnp.float32)         # (bsz,)
    # A sample with zero valid tokens gives NaN (0/0), like F.cross_entropy.
    ce_losses = jnp.sum(jnp.where(mask, nll, 0.0), axis=1) / counts

    # seq_prob = exp(-#tokens * ce) -- may underflow for long sequences, same
    # as the PyTorch reference.
    seq_prob_exp = jnp.exp(-counts * ce_losses)

    out_seq_probs = []
    branch_losses = []
    start = 0
    for bn in branch_nums:
        out_seq_probs.append(seq_prob_exp[start:start + bn])
        # -log(mean(exp(-ce))) via logsumexp: identical math, safer in f32.
        branch_losses.append(
            -(jax.nn.logsumexp(-ce_losses[start:start + bn])
              - jnp.log(float(bn))))
        start += bn
    loss = jnp.mean(jnp.stack(branch_losses))
    # TODO(synk): PyTorch returns out_seq_probs as detached host numpy arrays;
    # here they stay as JAX device arrays.
    return loss, out_seq_probs


def _reference(tgt_tokens, pred_f32, branch_nums):
    """Pure-numpy reference of the PyTorch forward, for a sanity check."""
    tgt = np.asarray(tgt_tokens)
    logits = np.asarray(pred_f32, dtype=np.float64)
    bsz, L, V = logits.shape
    ce = np.zeros(bsz)
    for i in range(bsz):
        m = logits[i].max(-1, keepdims=True)
        lse = m[:, 0] + np.log(np.exp(logits[i] - m).sum(-1))
        losses, n = 0.0, 0
        for t in range(L):
            if tgt[i, t] == IGNORE_INDEX:
                continue
            losses += lse[t] - logits[i, t, tgt[i, t]]
            n += 1
        ce[i] = losses / n
    branch_loss = []
    start = 0
    for bn in branch_nums:
        branch_loss.append(-np.log(np.mean(np.exp(-ce[start:start + bn]))))
        start += bn
    return float(np.mean(branch_loss)), ce


if __name__ == "__main__":
    root = jax.random.PRNGKey(0)
    k_pred, k_tgt, k_mask, k_pred2, k_tgt2 = jax.random.split(root, 5)

    # ---- Test 1: small vocab (single vocab tile), f32 and bf16 logits ----
    bsz, L, V = 6, 8, 512
    branch_nums = [2, 3, 1]
    pred = jax.random.normal(k_pred, (bsz, L, V), dtype=jnp.float32)
    tgt = jax.random.randint(k_tgt, (bsz, L), 0, V, dtype=jnp.int32)
    pad_mask = jax.random.bernoulli(k_mask, 0.3, (bsz, L))
    pad_mask = pad_mask.at[:, 0].set(False)     # >= 1 valid token per sample
    tgt = jnp.where(pad_mask, IGNORE_INDEX, tgt)

    loss, out_seq_probs = seq2set_loss(tgt, pred, branch_nums)
    loss = jax.block_until_ready(loss)
    ref_loss, ref_ce = _reference(tgt, pred, branch_nums)
    assert np.allclose(np.asarray(loss), ref_loss, rtol=1e-4, atol=1e-5), (
        float(loss), ref_loss)
    assert [int(p.shape[0]) for p in out_seq_probs] == list(branch_nums)
    counts_np = np.sum(np.asarray(tgt) != IGNORE_INDEX, axis=1)
    ref_probs = np.exp(-counts_np * ref_ce)
    got_probs = np.concatenate([np.asarray(p) for p in out_seq_probs])
    assert np.allclose(got_probs, ref_probs, rtol=1e-4, atol=1e-6)

    pred_bf16 = pred.astype(jnp.bfloat16)
    loss_bf16, _ = seq2set_loss(tgt, pred_bf16, branch_nums)
    loss_bf16 = jax.block_until_ready(loss_bf16)
    ref_loss_bf16, _ = _reference(tgt, pred_bf16.astype(jnp.float32),
                                  branch_nums)
    assert np.allclose(np.asarray(loss_bf16), ref_loss_bf16,
                       rtol=2e-3, atol=2e-3), (float(loss_bf16), ref_loss_bf16)

    # ---- Test 2: vocab larger than one tile (online LSE + masked tail) ----
    bsz2, L2, V2 = 4, 4, 9001            # V2 > _V_TILE_MAX, V2 % v_tile != 0
    branch2 = [1, 3]
    pred2 = jax.random.normal(k_pred2, (bsz2, L2, V2), dtype=jnp.float32)
    tgt2 = jax.random.randint(k_tgt2, (bsz2, L2), 0, V2, dtype=jnp.int32)
    tgt2 = tgt2.at[:, -1].set(IGNORE_INDEX)
    loss2, _ = seq2set_loss(tgt2, pred2, branch2)
    loss2 = jax.block_until_ready(loss2)
    ref_loss2, _ = _reference(tgt2, pred2, branch2)
    assert np.allclose(np.asarray(loss2), ref_loss2, rtol=1e-4, atol=1e-5), (
        float(loss2), ref_loss2)

    print("KERNEL_OK")
</pallas_src>

<mosaic_0001>
module attributes {stable_mosaic.version = 11 : i64} {
  func.func @_nll_kernel(%arg0: i32, %arg1: i32, %arg2: memref<32x1xi32, #tpu.memory_space<vmem>>, %arg3: memref<32x512xf32, #tpu.memory_space<vmem>>, %arg4: memref<32x1xf32, #tpu.memory_space<vmem>>, %arg5: memref<32x1xf32, #tpu.memory_space<vmem>>, %arg6: memref<32x1xf32, #tpu.memory_space<vmem>>, %arg7: memref<32x1xf32, #tpu.memory_space<vmem>>) attributes {dimension_semantics = [#tpu.dimension_semantics<parallel>, #tpu.dimension_semantics<arbitrary>], iteration_bounds = array<i64: 2, 1>, scalar_prefetch = 0 : i64, scratch_operands = 3 : i64, tpu.core_type = #tpu.core_type<tc>, window_params = [{transform_indices = @transform_0, window_bounds = array<i64: 32, 1>}, {transform_indices = @transform_1, window_bounds = array<i64: 32, 512>}, {transform_indices = @transform_2, window_bounds = array<i64: 32, 1>}]} {
    %c0_i32 = arith.constant 0 : i32
    %0 = arith.cmpi eq, %arg1, %c0_i32 : i32
    %1 = arith.extui %0 : i1 to i32
    %c0_i32_0 = arith.constant 0 : i32
    %2 = arith.cmpi ne, %1, %c0_i32_0 : i32
    scf.if %2 {
      %cst_21 = arith.constant 0xFF800000 : f32
      %37 = vector.broadcast %cst_21 : f32 to vector<32x1xf32>
      %c0_22 = arith.constant 0 : index
      %c0_23 = arith.constant 0 : index
      %38 = vector.load %arg5[%c0_22, %c0_23] : memref<32x1xf32, #tpu.memory_space<vmem>>, vector<32x1xf32>
      tpu.vector_store %arg5[%c0_22, %c0_23], %37 {strides = array<i32>} : memref<32x1xf32, #tpu.memory_space<vmem>>, vector<32x1xf32>,
      %cst_24 = arith.constant 0.000000e+00 : f32
      %39 = vector.broadcast %cst_24 : f32 to vector<32x1xf32>
      %c0_25 = arith.constant 0 : index
      %c0_26 = arith.constant 0 : index
      %40 = vector.load %arg6[%c0_25, %c0_26] : memref<32x1xf32, #tpu.memory_space<vmem>>, vector<32x1xf32>
      tpu.vector_store %arg6[%c0_25, %c0_26], %39 {strides = array<i32>} : memref<32x1xf32, #tpu.memory_space<vmem>>, vector<32x1xf32>,
      %cst_27 = arith.constant 0.000000e+00 : f32
      %41 = vector.broadcast %cst_27 : f32 to vector<32x1xf32>
      %c0_28 = arith.constant 0 : index
      %c0_29 = arith.constant 0 : index
      %42 = vector.load %arg7[%c0_28, %c0_29] : memref<32x1xf32, #tpu.memory_space<vmem>>, vector<32x1xf32>
      tpu.vector_store %arg7[%c0_28, %c0_29], %41 {strides = array<i32>} : memref<32x1xf32, #tpu.memory_space<vmem>>, vector<32x1xf32>,
    } else {
    }
    %3 = tpu.iota {dimensions = array<i32: 1>} : vector<32x512xi32>
    %c0 = arith.constant 0 : index
    %c0_1 = arith.constant 0 : index
    %4 = vector.load %arg2[%c0, %c0_1] : memref<32x1xi32, #tpu.memory_space<vmem>>, vector<32x1xi32>
    %c512_i32 = arith.constant 512 : i32
    %5 = arith.muli %arg1, %c512_i32 : i32
    %6 = vector.broadcast %5 : i32 to vector<32x1xi32>
    %7 = arith.subi %4, %6 : vector<32x1xi32>
    %c0_2 = arith.constant 0 : index
    %c0_3 = arith.constant 0 : index
    %8 = vector.load %arg3[%c0_2, %c0_3] : memref<32x512xf32, #tpu.memory_space<vmem>>, vector<32x512xf32>
    %cst = arith.constant dense<0xFF800000> : vector<32xf32>
    %9 = vector.multi_reduction <maximumf>, %8, %cst [1] : vector<32x512xf32> to vector<32xf32>
    %10 = vector.shape_cast %9 : vector<32xf32> to vector<32x1xf32>
    %11 = vector.broadcast %7 : vector<32x1xi32> to vector<32x512xi32>
    %12 = arith.cmpi eq, %3, %11 : vector<32x512xi32>
    %cst_4 = arith.constant 0.000000e+00 : f32
    %13 = vector.broadcast %cst_4 : f32 to vector<32x512xf32>
    %14 = arith.select %12, %8, %13 : vector<32x512xi1>, vector<32x512xf32>
    %cst_5 = arith.constant dense<0.000000e+00> : vector<32xf32>
    %15 = vector.multi_reduction <add>, %14, %cst_5 [1] : vector<32x512xf32> to vector<32xf32>
    %16 = vector.shape_cast %15 : vector<32xf32> to vector<32x1xf32>
    %c0_6 = arith.constant 0 : index
    %c0_7 = arith.constant 0 : index
    %17 = vector.load %arg5[%c0_6, %c0_7] : memref<32x1xf32, #tpu.memory_space<vmem>>, vector<32x1xf32>
    %18 = arith.maximumf %17, %10 : vector<32x1xf32>
    %c0_8 = arith.constant 0 : index
    %c0_9 = arith.constant 0 : index
    %19 = vector.load %arg6[%c0_8, %c0_9] : memref<32x1xf32, #tpu.memory_space<vmem>>, vector<32x1xf32>
    %20 = arith.subf %17, %18 : vector<32x1xf32>
    %21 = math.exp %20 : vector<32x1xf32>
    %22 = arith.mulf %19, %21 : vector<32x1xf32>
    %23 = vector.broadcast %18 : vector<32x1xf32> to vector<32x512xf32>
    %24 = arith.subf %8, %23 : vector<32x512xf32>
    %25 = math.exp %24 : vector<32x512xf32>
    %cst_10 = arith.constant dense<0.000000e+00> : vector<32xf32>
    %26 = vector.multi_reduction <add>, %25, %cst_10 [1] : vector<32x512xf32> to vector<32xf32>
    %27 = vector.shape_cast %26 : vector<32xf32> to vector<32x1xf32>
    %28 = arith.addf %22, %27 : vector<32x1xf32>
    %c0_11 = arith.constant 0 : index
    %c0_12 = arith.constant 0 : index
    %29 = vector.load %arg6[%c0_11, %c0_12] : memref<32x1xf32, #tpu.memory_space<vmem>>, vector<32x1xf32>
    tpu.vector_store %arg6[%c0_11, %c0_12], %28 {strides = array<i32>} : memref<32x1xf32, #tpu.memory_space<vmem>>, vector<32x1xf32>,
    %c0_13 = arith.constant 0 : index
    %c0_14 = arith.constant 0 : index
    %30 = vector.load %arg7[%c0_13, %c0_14] : memref<32x1xf32, #tpu.memory_space<vmem>>, vector<32x1xf32>
    %31 = arith.addf %30, %16 : vector<32x1xf32>
    %c0_15 = arith.constant 0 : index
    %c0_16 = arith.constant 0 : index
    %32 = vector.load %arg7[%c0_15, %c0_16] : memref<32x1xf32, #tpu.memory_space<vmem>>, vector<32x1xf32>
    tpu.vector_store %arg7[%c0_15, %c0_16], %31 {strides = array<i32>} : memref<32x1xf32, #tpu.memory_space<vmem>>, vector<32x1xf32>,
    %c0_17 = arith.constant 0 : index
    %c0_18 = arith.constant 0 : index
    %33 = vector.load %arg5[%c0_17, %c0_18] : memref<32x1xf32, #tpu.memory_space<vmem>>, vector<32x1xf32>
    tpu.vector_store %arg5[%c0_17, %c0_18], %18 {strides = array<i32>} : memref<32x1xf32, #tpu.memory_space<vmem>>, vector<32x1xf32>,
    %c0_i32_19 = arith.constant 0 : i32
    %34 = arith.cmpi eq, %arg1, %c0_i32_19 : i32
    %35 = arith.extui %34 : i1 to i32
    %c0_i32_20 = arith.constant 0 : i32
    %36 = arith.cmpi ne, %35, %c0_i32_20 : i32
    scf.if %36 {
      %c0_21 = arith.constant 0 : index
      %c0_22 = arith.constant 0 : index
      %37 = vector.load %arg5[%c0_21, %c0_22] : memref<32x1xf32, #tpu.memory_space<vmem>>, vector<32x1xf32>
      %c0_23 = arith.constant 0 : index
      %c0_24 = arith.constant 0 : index
      %38 = vector.load %arg6[%c0_23, %c0_24] : memref<32x1xf32, #tpu.memory_space<vmem>>, vector<32x1xf32>
      %39 = math.log %38 : vector<32x1xf32>
      %40 = arith.addf %37, %39 : vector<32x1xf32>
      %c0_25 = arith.constant 0 : index
      %c0_26 = arith.constant 0 : index
      %41 = vector.load %arg7[%c0_25, %c0_26] : memref<32x1xf32, #tpu.memory_space<vmem>>, vector<32x1xf32>
      %42 = arith.subf %40, %41 : vector<32x1xf32>
      %c0_27 = arith.constant 0 : index
      %c0_28 = arith.constant 0 : index
      %43 = vector.load %arg4[%c0_27, %c0_28] : memref<32x1xf32, #tpu.memory_space<vmem>>, vector<32x1xf32>
      tpu.vector_store %arg4[%c0_27, %c0_28], %42 {strides = array<i32>} : memref<32x1xf32, #tpu.memory_space<vmem>>, vector<32x1xf32>,
    } else {
    }
    return
  }
  func.func @transform_0(%arg0: i32, %arg1: i32) -> (i32, i32) {
    %c0_i32 = arith.constant 0 : i32
    %c0_i32_0 = arith.constant 0 : i32
    return %arg0, %c0_i32 : i32, i32
  }
  func.func @transform_1(%arg0: i32, %arg1: i32) -> (i32, i32) {
    %c0_i32 = arith.constant 0 : i32
    return %arg0, %arg1 : i32, i32
  }
  func.func @transform_2(%arg0: i32, %arg1: i32) -> (i32, i32) {
    %c0_i32 = arith.constant 0 : i32
    %c0_i32_0 = arith.constant 0 : i32
    return %arg0, %c0_i32 : i32, i32
  }
}

</mosaic_0001>

<bundles_post_ra>
// kernel: tpu_custom_call.1
= control target key start
LH: loop header
LB: loop body
LE: loop exit
PB: predicated region body
PF: predicated region fallthrough
CT: control target
= control target key end

     0   :  { %7 = vsyncpa [#allocation6], 0  ;;  %s1567_s0 = inlined_call_operand.vmem [shape: s32[48,1], index: 0, kind: input, shape index: {}]   ;;  %s1568_s1 = inlined_call_operand.hbm [shape: f32[48,512], index: 1, kind: input, shape index: {}]   ;;  %s1569_s2 = inlined_call_operand.vmem [shape: f32[48,1], index: 2, kind: output, shape index: {}]  }
   0x1   :  { %9 = vsyncpa [#allocation6 + $0x1], 0  ;;  %s1179_s9 = smov 0   ;;  %s1181_s10 = smov 0  }
   0x2   :  { %s1183_s11 = smov 0   ;;  %s1185_s12 = smov 0  }
   0x3   :  { %s1187_s13 = smov 0   ;;  %s1189_s14 = smov 0  }
   0x4 LB: > { %s805_s15 = sadd.s32 4294967295, %s1124_s14   ;;  %s27_s16 = sadd.s32 1, %s1120_s13  ;;  %s1124_s14 = sphi %s1189_s14, %s15_s14   ;;  %s1120_s13 = sphi %s1187_s13, %s1579_s13   ;;  %s1116_s12 = sphi %s1185_s12, %s1578_s12   ;;  %s1112_s11 = sphi %s1183_s11, %s1577_s11   ;;  %s1108_s10 = sphi %s1181_s10, %s1576_s10   ;;  %s1104_s9 = sphi %s1179_s9, %s1575_s9  }
   0x5   : > { %p29_p0 = scmp.ge.s32.totalorder %s27_s16, 2  ;;  %s62_s17 = sadd.s32 1, %s1112_s11 }
   0x6   : > { %p69_p1 = scmp.ne.s32.totalorder %s1112_s11, %s1108_s10  ;;  %p70_p2 = scmp.eq.s32.totalorder %s1124_s14, 0 }
   0x7   : > { %s1581_s16 = smov (%p29_p0, %s27_s16), 0  ;;  %p75_p4 = scmp.ne.s32.totalorder %s1108_s10, %s1104_s9 }
   0x8   : > { %p71_p3 = por %p70_p2, %p69_p1  ;;  %s57_s18 = ssub.s32 %s1120_s13, %s1581_s16 }
   0x9   : > { %p76_p5 = scmp.eq.s32.totalorder %s805_s15, 0  ;;  %p60_p6 = scmp.eq.s32.totalorder %s57_s18, 0 }
   0xa   : > { %p99_p7 = scmp.eq.s32.totalorder %s805_s15, 1  ;;  %p808_p10 = scmp.ge.s32.totalorder %s1124_s14, 2 }
   0xb   : > { %p1218_p8 = por %p76_p5, %p75_p4 }
   0xc   : > { %s1223_s20 = scalar_select %p60_p6, %s1112_s11, %s62_s17  }
   0xd   : > { %p1225_p9 = por %p99_p7, %p69_p1  ;;  %121 = sbr.rel (%p808_p10) target bundleno = 55 (0x37), region = 16 }
  0x14   : > { %141 = sbr.rel (!%p71_p3) target bundleno = 55 (0x37), region = 24  ;;  %s142_s22 = sand.u32 (%p71_p3), 1, %s1112_s11  }
  0x15   : > { %s810_s23 = sshll.u32 (%p71_p3), %s1120_s13, 2  ;;  %s809_s24 = sshll.u32 (%p71_p3), %s142_s22, 7 }
  0x16   : > { %s149_s25 = ssub.s32 (%p71_p3), 6, %s810_s23  ;;  %s1235_s28 = scalar_lea.sflag (%p71_p3), [#allocation6], %s142_s22 }
  0x17   : > { %p150_p11 = scmp.lt.s32.totalorder (%p71_p3), %s149_s25, 4  ;;  %s146_s29 = scalar_lea.vmem (%p71_p3), [#allocation5], %s809_s24 }
  0x1b   : > { %s1583_s25 = smov (!%p150_p11, %s149_s25), 4 }
  0x1c   : > { %s1232_s26 = sshll.u32 %s1583_s25, 9 }
  0x1d   : > { %s155_s27 = ssub.s32 2048, %s1232_s26 }
  0x1e   : > { %156 = vsyncadd %s1235_s28, %s155_s27  ;;  %p813_p12 = scmp.ne.s32.totalorder %s1232_s26, 0  ;;  %s842_s30 = sshll.u32 %s1120_s13, 11 }
  0x1f   : > { %s1243_s5 = scalar_lea.hbm %s1568_s1, %s842_s30  ;;  %s163_s6 = sshll.u32 %s146_s29, 4  ;;  %s1245_s6 = int_to_ptr.vmem [resolvable:$true] %s163_s6 }
  0x20   : > { %s1014_s7 = scalar_lea.hbm %s1243_s5, %s1232_s26  ;;  %s1018_s15 = scalar_lea.hbm %s1568_s1, 3072 }
  0x21   : > { %p1015_p13 = scmp.ne.s32.totalorder %s1243_s5, %s1014_s7  ;;  %p1019_p2 = scmp.lt.u32.totalorder %s1243_s5, %s1568_s1 }
  0x22   : > { %p1020_p3 = scmp.lt.u32.totalorder %s1018_s15, %s1014_s7  ;;  %p1022_p5 = scmp.lt.u32.totalorder %s1014_s7, %s1243_s5 }
  0x23   : > { %p1016_p0 = pnand %p1015_p13, %p813_p12 }
  0x24   : > { %p1021_p4 = por %p1020_p3, %p1019_p2 }
  0x25   : > { %p1017_p1 = pneg %p1016_p0 }
  0x26   : > { %p1023_p6 = por %p1022_p5, %p1021_p4 }
  0x28   : > { %p1024_p7 = pnand %p1023_p6, %p1017_p1 }
  0x2a   : > { %1027 = shalt.err (!%p1024_p7)
}
  0x2b   : > { %s1028_s22 = scalar_lea.vmem %s1245_s6, %s1232_s26  ;;  %s1158_s23 = smov [#allocation5]  }
  0x2c   : > { %p1029_p10 = scmp.ne.s32.totalorder %s1245_s6, %s1028_s22  ;;  %s1032_s24 = sshll.u32 %s1158_s23, 4  ;;  %s1033_s24 = int_to_ptr.vmem [resolvable:$false] %s1032_s24 }
  0x2d   : > { %s1034_s25 = scalar_lea.vmem %s1033_s24, 4096  ;;  %p1035_p0 = scmp.lt.s32.totalorder %s1245_s6, %s1033_s24 }
  0x2e   : > { %p1030_p11 = pnand %p1029_p10, %p813_p12  ;;  %p1036_p2 = scmp.lt.s32.totalorder %s1034_s25, %s1028_s22 }
  0x30   : > { %p1031_p13 = pneg %p1030_p11  ;;  %p1037_p3 = por %p1036_p2, %p1035_p0 }
  0x32   : > { %p1038_p4 = pnand %p1037_p3, %p1031_p13 }
  0x34   : > { %1041 = shalt.err (!%p1038_p4)
}
  0x35   : > { %s1159_s27 = smov 512   ;;  %s1160_s29 = smov 32  }
  0x36   : > { %169 = dma.hbm_to_vmem [thread:$0]  (%p813_p12), %s1243_s5, %s1232_s26, %s1245_s6, %s1235_s28, %s1159_s27, %s1159_s27, %s1160_s29  }
  0x37 PF: > { %p818_p1 = scmp.ge.s32.totalorder %s1124_s14, 1  ;;  %p171_p5 = scmp.lt.s32.totalorder %s1124_s14, 3 }
  0x39   : > { %p172_p6 = pnand %p818_p1, %p171_p5 }
  0x3a   : > { %s1275_s30 = sand.u32 (!%p172_p6), 1, %s1108_s10  }
  0x3b   : > { %175 = sbr.rel (%p172_p6) target bundleno = 599 (0x257), region = 28  ;;  %s819_s3 = sshll.u32 (!%p172_p6), %s1275_s30, 7 }
  0x3c   : > { %s178_s4 = scalar_lea.sflag (!%p172_p6), [#allocation6], %s1275_s30  ;;  %s1279_s7 = scalar_lea.vmem (!%p172_p6), [#allocation5], %s819_s3 }
  0x42   : > { %1099 = dma.done.wait (%p1218_p8), %s178_s4, 2048  }
  0x43   : > { %1101 = vsyncadd (%p1218_p8), %s178_s4, 4294965248  ;;  %vm240_vm0 = vcmask 7168   ;;  %v1161_v0 = vmov -inf   ;;  %v1290_v1 = vld [vmem:[%s1279_s7] sm:$0xff]  ;;  %v1293_v2 = vld [vmem:[%s1279_s7 + $0x8] sm:$0xff]  ;;  %v1162_v29 = vmov 0   ;;  %v253_v61 = vlaneseq }
  0x44   : > { %241 = vst.msk [vmem:[#allocation2] sm:$0xff] %vm240_vm0, %v1161_v0  ;;  %242 = vst.msk [vmem:[#allocation2 + $0x8] sm:$0xff] %vm240_vm0, %v1161_v0  ;;  %v1296_v3 = vld [vmem:[%s1279_s7 + $0x10] sm:$0xff]  ;;  %v284_v4 = vmax.f32 %v1290_v1, %v1293_v2  ;;  %v1301_v5 = vld [vmem:[%s1279_s7 + $0x20] sm:$0xff]  ;;  %964 = vset.pattern.permute.xlu0 %v1162_v29  ;;  %965 = vset.pattern.permute.xlu1 %v1162_v29  ;;  %v1163_v30 = vmov 0.0   ;;  %s1364_s19 = sshll.u32 %s1116_s12, 2 }
  0x45   : > { %243 = vst.msk [vmem:[#allocation2 + $0x10] sm:$0xff] %vm240_vm0, %v1161_v0  ;;  %244 = vst.msk [vmem:[#allocation2 + $0x18] sm:$0xff] %vm240_vm0, %v1161_v0  ;;  %v1304_v6 = vld [vmem:[%s1279_s7 + $0x28] sm:$0xff]  ;;  %v1307_v7 = vld [vmem:[%s1279_s7 + $0x18] sm:$0xff]  ;;  %p215_p8 = scmp.lt.s32.totalorder %s1364_s19, 5  ;;  %s820_s9 = sshll.u32 %s1275_s30, 5 }
  0x46   : > { %v1310_v8 = vld [vmem:[%s1279_s7 + $0x30] sm:$0xff]  ;;  %v289_v9 = vmax.f32 %v1301_v5, %v1304_v6  ;;  %v1315_v10 = vld [vmem:[%s1279_s7 + $0x40] sm:$0xff]  ;;  %v285_v11 = vmax.f32 %v284_v4, %v1296_v3  ;;  %v1319_v12 = vld [vmem:[%s1279_s7 + $0x38] sm:$0xff]  ;;  %245 = vst.msk [vmem:[#allocation3] sm:$0xff] %vm240_vm0, %v1163_v30  ;;  %s1493_s15 = scalar_lea.vmem [#allocation7], %s820_s9   ;;  %s552_s17 = ssub.s32 (%p1225_p9), 6, %s1364_s19 }
  0x47   : > { %v1322_v13 = vld [vmem:[%s1279_s7 + $0x48] sm:$0xff]  ;;  %v1325_v14 = vld [vmem:[%s1279_s7 + $0x50] sm:$0xff]  ;;  %v1331_v17 = vld [vmem:[%s1279_s7 + $0x60] sm:$0xff]  ;;  %246 = vst.msk [vmem:[#allocation3 + $0x8] sm:$0xff] %vm240_vm0, %v1163_v30  ;;  %s216_s26 = scalar_select %p215_p8, %s1364_s19, 5 }
  0x48   : > { %v290_v15 = vmax.f32 %v289_v9, %v1310_v8  ;;  %v294_v16 = vmax.f32 %v1315_v10, %v1322_v13  ;;  %v1334_v18 = vld [vmem:[%s1279_s7 + $0x68] sm:$0xff]  ;;  %v1337_v19 = vld [vmem:[%s1279_s7 + $0x70] sm:$0xff]  ;;  %v286_v20 = vmax.f32 %v285_v11, %v1307_v7  ;;  %v1341_v21 = vld [vmem:[%s1279_s7 + $0x58] sm:$0xff]  ;;  %247 = vst.msk [vmem:[#allocation3 + $0x10] sm:$0xff] %vm240_vm0, %v1163_v30  ;;  %s843_s18 = sshll.u32 (%p1225_p9), %s1116_s12, 5  ;;  %p553_p12 = scmp.lt.s32.totalorder (%p1225_p9), %s552_s17, 4 }
  0x49   : > { %v299_v22 = vmax.f32 %v1331_v17, %v1334_v18  ;;  %v1348_v25 = vld [vmem:[%s1279_s7 + $0x78] sm:$0xff]  ;;  %248 = vst.msk [vmem:[#allocation3 + $0x18] sm:$0xff] %vm240_vm0, %v1163_v30  ;;  %249 = vst.msk [vmem:[#allocation4] sm:$0xff] %vm240_vm0, %v1163_v30  ;;  %s822_s28 = sshll.u32 %s216_s26, 3  ;;  %s1510_s24 = scalar_lea.vmem (%p1225_p9), %s1569_s2, %s843_s18  }
  0x4a   : > { %v295_v23 = vmax.f32 %v294_v16, %v1325_v14  ;;  %287 = vmax.xlane.f32.xlu0 %v286_v20  ;;  %v291_v24 = vmax.f32 %v290_v15, %v1319_v12  ;;  %250 = vst.msk [vmem:[#allocation4 + $0x8] sm:$0xff] %vm240_vm0, %v1163_v30  ;;  %251 = vst.msk [vmem:[#allocation4 + $0x10] sm:$0xff] %vm240_vm0, %v1163_v30  ;;  %s218_s8 = scalar_lea.vmem %s1567_s0, %s822_s28 }
  0x4b   : > { %v300_v26 = vmax.f32 %v299_v22, %v1337_v19  ;;  %252 = vst.msk [vmem:[#allocation4 + $0x18] sm:$0xff] %vm240_vm0, %v1163_v30  ;;  %v1361_v31 = vld [vmem:[#allocation2] sm:$0xff]  ;;  %v1371_v35 = vld [vmem:[#allocation2 + $0x8] sm:$0xff]  ;;  %v260_v49 = vld [vmem:[%s218_s8 + $0x10] sm:$0xff]  ;;  %v1417_v22 = vand.u32 127, %v253_v61 }
  0x4c   : > { %v296_v27 = vmax.f32 %v295_v23, %v1341_v21  ;;  %v1369_v34 = vld [vmem:[#allocation2 + $0x10] sm:$0xff]  ;;  %v1385_v41 = vld [vmem:[#allocation2 + $0x18] sm:$0xff]  ;;  %v258_v47 = vld [vmem:[%s218_s8] sm:$0xff] }
  0x4d   : > { %v301_v28 = vmax.f32 %v300_v26, %v1348_v25  ;;  %v259_v48 = vld [vmem:[%s218_s8 + $0x8] sm:$0xff]  ;;  %v261_v50 = vld [vmem:[%s218_s8 + $0x18] sm:$0xff] }
  0x4e   : > { %297 = vmax.xlane.f32.xlu1 %v296_v27  ;;  %292 = vmax.xlane.f32.xlu0 %v291_v24 }
  0x52   : > { %302 = vmax.xlane.f32.xlu1 %v301_v28 }
  0xd7   : > { %v288_v32 = vpop.xlane.xlu0 %287 }
  0xd8   : > { %v1367_v33 = vmax.f32 %v1361_v31, %v288_v32 }
  0xda   : > { %v380_v36 = vsub.f32 %v1361_v31, %v1367_v33  ;;  %505 = vst.msk [vmem:[#allocation2] sm:$0xff] %vm240_vm0, %v1367_v33  ;;  %398 = vperm.xlu0 %964, %v1367_v33  }
  0xdb   : > { %v298_v37 = vpop.xlane.xlu1 %297  ;;  %v293_v38 = vpop.xlane.xlu0 %292 }
  0xdc   : > { %v1380_v39 = vmax.f32 %v1369_v34, %v298_v37  ;;  %v1383_v40 = vmax.f32 %v1371_v35, %v293_v38  ;;  %v1424_v38 = vadd.s32 128, %v1417_v22 }
  0xde   : > { %v382_v42 = vsub.f32 %v1369_v34, %v1380_v39  ;;  %507 = vst.msk [vmem:[#allocation2 + $0x10] sm:$0xff] %vm240_vm0, %v1380_v39  ;;  %v381_v43 = vsub.f32 %v1371_v35, %v1383_v40  ;;  %506 = vst.msk [vmem:[#allocation2 + $0x8] sm:$0xff] %vm240_vm0, %v1383_v40  ;;  %403 = vperm.xlu1 %965, %v1383_v40   ;;  %v378_v34 = vld [vmem:[#allocation3 + $0x10] sm:$0xff] }
  0xdf   : > { %v303_v44 = vpop.xlane.xlu1 %302 }
  0xe0   : > { %v1398_v45 = vmax.f32 %v1385_v41, %v303_v44 }
  0xe2   : > { %v383_v46 = vsub.f32 %v1385_v41, %v1398_v45  ;;  %508 = vst.msk [vmem:[#allocation2 + $0x18] sm:$0xff] %vm240_vm0, %v1398_v45  ;;  %408 = vperm.xlu1 %965, %v1380_v39  }
  0xe6   : > { %413 = vperm.xlu1 %965, %v1398_v45  }
  0xea   : > { %305 = vperm.xlu1 %965, %v258_v47  }
  0xee   : > { %308 = vperm.xlu1 %965, %v259_v48  }
  0xf2   : > { %311 = vperm.xlu1 %965, %v260_v49  }
  0xf6   : > { %314 = vperm.xlu1 %965, %v261_v50  }
 0x159   : > { %v399_v51 = vpop.permute.xlu0 %398 }
 0x15a   : > { %v416_v52 = vsub.f32 %v1290_v1, %v399_v51  ;;  %v417_v53 = vsub.f32 %v1293_v2, %v399_v51  ;;  %v418_v54 = vsub.f32 %v1296_v3, %v399_v51  ;;  %v419_v55 = vsub.f32 %v1307_v7, %v399_v51 }
 0x15c   : > { %v432_v56 = vmul.f32 1.442695, %v416_v52  ;;  %v434_v57 = vmul.f32 1.442695, %v417_v53  ;;  %v436_v58 = vmul.f32 1.442695, %v418_v54 }
 0x15d   : > { %v438_v59 = vmul.f32 1.442695, %v419_v55  ;;  %v404_v60 = vpop.permute.xlu1 %403 }
 0x15e   : > { %966 = vpow2.f32 %v432_v56  ;;  %v420_v62 = vsub.f32 %v1301_v5, %v404_v60  ;;  %v421_v63 = vsub.f32 %v1304_v6, %v404_v60  ;;  %v422_v0 = vsub.f32 %v1310_v8, %v404_v60 }
 0x15f   : > { %968 = vpow2.f32 %v434_v57  ;;  %v423_v4 = vsub.f32 %v1319_v12, %v404_v60 }
 0x160   : > { %970 = vpow2.f32 %v436_v58  ;;  %v440_v9 = vmul.f32 1.442695, %v420_v62  ;;  %v442_v11 = vmul.f32 1.442695, %v421_v63  ;;  %v444_v15 = vmul.f32 1.442695, %v422_v0 }
 0x161   : > { %972 = vpow2.f32 %v438_v59  ;;  %v446_v16 = vmul.f32 1.442695, %v423_v4  ;;  %v409_v20 = vpop.permute.xlu1 %408  ;;  %v1433_v62 = vadd.s32 256, %v1417_v22 }
 0x162   : > { %974 = vpow2.f32 %v440_v9  ;;  %v424_v23 = vsub.f32 %v1315_v10, %v409_v20  ;;  %v425_v24 = vsub.f32 %v1322_v13, %v409_v20  ;;  %v426_v26 = vsub.f32 %v1325_v14, %v409_v20 }
 0x163   : > { %976 = vpow2.f32 %v442_v11  ;;  %v427_v27 = vsub.f32 %v1341_v21, %v409_v20 }
 0x164   : > { %978 = vpow2.f32 %v444_v15  ;;  %v448_v28 = vmul.f32 1.442695, %v424_v23  ;;  %v450_v29 = vmul.f32 1.442695, %v425_v24  ;;  %v452_v30 = vmul.f32 1.442695, %v426_v26 }
 0x165   : > { %980 = vpow2.f32 %v446_v16  ;;  %v454_v32 = vmul.f32 1.442695, %v427_v27  ;;  %v414_v37 = vpop.permute.xlu1 %413  ;;  %v257_v26 = vadd.s32 384, %v1417_v22 }
 0x166   : > { %982 = vpow2.f32 %v448_v28  ;;  %v428_v44 = vsub.f32 %v1331_v17, %v414_v37  ;;  %v429_v47 = vsub.f32 %v1334_v18, %v414_v37  ;;  %v430_v48 = vsub.f32 %v1337_v19, %v414_v37 }
 0x167   : > { %984 = vpow2.f32 %v450_v29  ;;  %v431_v49 = vsub.f32 %v1348_v25, %v414_v37 }
 0x168   : > { %v967_v50 = vpop.eup %966  ;;  %986 = vpow2.f32 %v452_v30  ;;  %v456_v51 = vmul.f32 1.442695, %v428_v44  ;;  %v458_v52 = vmul.f32 1.442695, %v429_v47  ;;  %v460_v54 = vmul.f32 1.442695, %v430_v48 }
 0x169   : > { %v969_v53 = vpop.eup %968  ;;  %988 = vpow2.f32 %v454_v32  ;;  %v306_v55 = vpop.permute.xlu1 %305  ;;  %v462_v59 = vmul.f32 1.442695, %v431_v49 }
 0x16a   : > { %v971_v56 = vpop.eup %970  ;;  %990 = vpow2.f32 %v456_v51  ;;  %vm316_vm1 = vcmp.eq.s32.totalorder %v1417_v22, %v306_v55  ;;  %vm317_vm2 = vcmp.eq.s32.totalorder %v1424_v38, %v306_v55  ;;  %v464_v57 = vadd.f32 %v969_v53, %v967_v50 }
 0x16b   : > { %v973_v58 = vpop.eup %972  ;;  %992 = vpow2.f32 %v458_v52  ;;  %v332_v4 = vsel %vm316_vm1, %v1290_v1, 0.0  ;;  %v333_v9 = vsel %vm317_vm2, %v1293_v2, 0.0  ;;  %vm318_vm5 = vcmp.eq.s32.totalorder %v1433_v62, %v306_v55 }
 0x16c   : > { %v975_v60 = vpop.eup %974  ;;  %v465_v61 = vadd.f32 %v971_v56, %v464_v57  ;;  %994 = vpow2.f32 %v460_v54  ;;  %v348_v1 = vadd.f32 %v333_v9, %v332_v4  ;;  %v334_v47 = vsel %vm318_vm5, %v1296_v3, 0.0 }
 0x16d   : > { %v977_v63 = vpop.eup %976  ;;  %v1435_v0 = vpop.permute.xlu1 %308  ;;  %996 = vpow2.f32 %v462_v59  ;;  %vm319_vm8 = vcmp.eq.s32.totalorder %v257_v26, %v306_v55 }
 0x16e   : > { %v979_v11 = vpop.eup %978  ;;  %vm320_vm3 = vcmp.eq.s32.totalorder %v1417_v22, %v1435_v0  ;;  %vm321_vm4 = vcmp.eq.s32.totalorder %v1424_v38, %v1435_v0  ;;  %v466_v15 = vadd.f32 %v973_v58, %v465_v61  ;;  %v469_v16 = vadd.f32 %v977_v63, %v975_v60 }
 0x16f   : > { %v981_v20 = vpop.eup %980  ;;  %v336_v28 = vsel %vm320_vm3, %v1301_v5, 0.0  ;;  %v337_v29 = vsel %vm321_vm4, %v1304_v6, 0.0  ;;  %v349_v5 = vadd.f32 %v348_v1, %v334_v47  ;;  %vm322_vm10 = vcmp.eq.s32.totalorder %v1433_v62, %v1435_v0  ;;  %v493_v1 = vld [vmem:[#allocation4] sm:$0xff] }
 0x170   : > { %v983_v23 = vpop.eup %982  ;;  %467 = vadd.xlane.f32.xlu1 %v466_v15  ;;  %v470_v24 = vadd.f32 %v979_v11, %v469_v16  ;;  %v353_v54 = vadd.f32 %v337_v29, %v336_v28  ;;  %v335_v56 = vsel %vm319_vm8, %v1307_v7, 0.0  ;;  %vm323_vm13 = vcmp.eq.s32.totalorder %v257_v26, %v1435_v0  ;;  %v376_v16 = vld [vmem:[#allocation3] sm:$0xff] }
 0x171   : > { %v985_v2 = vpop.eup %984  ;;  %v312_v27 = vpop.permute.xlu1 %311  ;;  %v338_v57 = vsel %vm322_vm10, %v1310_v8, 0.0  ;;  %v350_v61 = vadd.f32 %v349_v5, %v335_v56  ;;  %v496_v5 = vld [vmem:[#allocation4 + $0x18] sm:$0xff] }
 0x172   : > { %v987_v30 = vpop.eup %986  ;;  %vm324_vm6 = vcmp.eq.s32.totalorder %v1417_v22, %v312_v27  ;;  %vm325_vm7 = vcmp.eq.s32.totalorder %v1424_v38, %v312_v27  ;;  %v471_v32 = vadd.f32 %v981_v20, %v470_v24  ;;  %v474_v37 = vadd.f32 %v985_v2, %v983_v23  ;;  %v377_v20 = vld [vmem:[#allocation3 + $0x8] sm:$0xff] }
 0x173   : > { %v989_v44 = vpop.eup %988  ;;  %v340_v48 = vsel %vm324_vm6, %v1315_v10, 0.0  ;;  %v341_v49 = vsel %vm325_vm7, %v1322_v13, 0.0  ;;  %vm326_vm9 = vcmp.eq.s32.totalorder %v1433_v62, %v312_v27  ;;  %vm327_vm14 = vcmp.eq.s32.totalorder %v257_v26, %v312_v27 }
 0x174   : > { %v991_v50 = vpop.eup %990  ;;  %472 = vadd.xlane.f32.xlu0 %v471_v32  ;;  %v475_v51 = vadd.f32 %v987_v30, %v474_v37  ;;  %v358_v53 = vadd.f32 %v341_v49, %v340_v48  ;;  %v343_v8 = vsel %vm327_vm14, %v1341_v21, 0.0  ;;  %v384_v21 = vmul.f32 1.442695, %v380_v36  ;;  %v494_v37 = vld [vmem:[#allocation4 + $0x8] sm:$0xff] }
 0x175   : > { %v993_v6 = vpop.eup %992  ;;  %v315_v52 = vpop.permute.xlu1 %314 }
 0x176   : > { %vm328_vm11 = vcmp.eq.s32.totalorder %v1417_v22, %v315_v52  ;;  %vm329_vm12 = vcmp.eq.s32.totalorder %v1424_v38, %v315_v52  ;;  %v476_v3 = vadd.f32 %v989_v44, %v475_v51  ;;  %v479_v10 = vadd.f32 %v993_v6, %v991_v50  ;;  %v995_v13 = vpop.eup %994  ;;  %v495_v44 = vld [vmem:[#allocation4 + $0x10] sm:$0xff] }
 0x177   : > { %v344_v58 = vsel %vm328_vm11, %v1331_v17, 0.0  ;;  %v345_v59 = vsel %vm329_vm12, %v1334_v18, 0.0  ;;  %v997_v60 = vpop.eup %996  ;;  %v342_v22 = vsel %vm326_vm9, %v1325_v14, 0.0  ;;  %v354_v38 = vadd.f32 %v353_v54, %v338_v57 }
 0x178   : > { %477 = vadd.xlane.f32.xlu0 %v476_v3  ;;  %v480_v55 = vadd.f32 %v995_v13, %v479_v10  ;;  %v359_v7 = vadd.f32 %v358_v53, %v342_v22  ;;  %vm330_vm15 = vcmp.eq.s32.totalorder %v1433_v62, %v315_v52  ;;  %v363_v4 = vadd.f32 %v345_v59, %v344_v58  ;;  %v512_v10 = vld [vmem:[#allocation2] sm:$0xff]  ;;  %v513_v59 = vld [vmem:[#allocation2 + $0x8] sm:$0xff] }
 0x179   : > { %v339_v17 = vsel %vm323_vm13, %v1319_v12, 0.0  ;;  %v346_v18 = vsel %vm330_vm15, %v1337_v19, 0.0  ;;  %vm331_vm1 = vcmp.eq.s32.totalorder %v257_v26, %v315_v52  ;;  %998 = vpow2.f32 %v384_v21 }
 0x17a   : > { %v481_v63 = vadd.f32 %v997_v60, %v480_v55  ;;  %v360_v9 = vadd.f32 %v359_v7, %v343_v8  ;;  %v355_v11 = vadd.f32 %v354_v38, %v339_v17  ;;  %v364_v14 = vadd.f32 %v363_v4, %v346_v18  ;;  %v514_v7 = vld [vmem:[#allocation2 + $0x10] sm:$0xff] }
 0x17b   : > { %v347_v15 = vsel %vm331_vm1, %v1348_v25, 0.0  ;;  %v386_v12 = vmul.f32 1.442695, %v381_v43  ;;  %v388_v19 = vmul.f32 1.442695, %v382_v42 }
 0x17c   : > { %351 = vadd.xlane.f32.xlu0 %v350_v61  ;;  %482 = vadd.xlane.f32.xlu1 %v481_v63  ;;  %v365_v62 = vadd.f32 %v364_v14, %v347_v15  ;;  %v390_v25 = vmul.f32 1.442695, %v383_v46  ;;  %v379_v46 = vld [vmem:[#allocation3 + $0x18] sm:$0xff] }
 0x17d   : > { %1000 = vpow2.f32 %v386_v12 }
 0x17e   : > { %1002 = vpow2.f32 %v388_v19 }
 0x17f   : > { %1004 = vpow2.f32 %v390_v25 }
 0x180   : > { %361 = vadd.xlane.f32.xlu0 %v360_v9  ;;  %356 = vadd.xlane.f32.xlu1 %v355_v11  ;;  %v515_v11 = vld [vmem:[#allocation2 + $0x18] sm:$0xff] }
 0x183   : > { %v999_v0 = vpop.eup %998 }
 0x184   : > { %366 = vadd.xlane.f32.xlu1 %v365_v62  ;;  %v392_v31 = vmul.f32 %v999_v0, %v376_v16 }
 0x187   : > { %v1001_v33 = vpop.eup %1000 }
 0x188   : > { %v393_v35 = vmul.f32 %v1001_v33, %v377_v20  ;;  %v1003_v40 = vpop.eup %1002 }
 0x189   : > { %v394_v42 = vmul.f32 %v1003_v40, %v378_v34  ;;  %v1005_v41 = vpop.eup %1004 }
 0x18a   : > { %v395_v2 = vmul.f32 %v1005_v41, %v379_v46 }
 0x1fd   : > { %v468_v36 = vpop.xlane.xlu1 %467 }
 0x1fe   : > { %v484_v23 = vadd.f32 %v468_v36, %v392_v31 }
 0x200   : > { %489 = vst.msk [vmem:[#allocation3] sm:$0xff] %vm240_vm0, %v484_v23 }
 0x201   : > { %v473_v43 = vpop.xlane.xlu0 %472 }
 0x202   : > { %v485_v39 = vadd.f32 %v473_v43, %v393_v35 }
 0x204   : > { %490 = vst.msk [vmem:[#allocation3 + $0x8] sm:$0xff] %vm240_vm0, %v485_v39 }
 0x205   : > { %v478_v45 = vpop.xlane.xlu0 %477 }
 0x206   : > { %v486_v24 = vadd.f32 %v478_v45, %v394_v42 }
 0x207   : > { %v516_v26 = vld [vmem:[#allocation3] sm:$0xff] }
 0x208   : > { %1006 = vlog2.f32 %v516_v26  ;;  %491 = vst.msk [vmem:[#allocation3 + $0x10] sm:$0xff] %vm240_vm0, %v486_v24 }
 0x209   : > { %v483_v27 = vpop.xlane.xlu1 %482  ;;  %v352_v28 = vpop.xlane.xlu0 %351 }
 0x20a   : > { %v487_v29 = vadd.f32 %v483_v27, %v395_v2  ;;  %v497_v30 = vadd.f32 %v493_v1, %v352_v28 }
 0x20b   : > { %v517_v32 = vld [vmem:[#allocation3 + $0x8] sm:$0xff] }
 0x20c   : > { %1008 = vlog2.f32 %v517_v32  ;;  %492 = vst.msk [vmem:[#allocation3 + $0x18] sm:$0xff] %vm240_vm0, %v487_v29  ;;  %501 = vst.msk [vmem:[#allocation4] sm:$0xff] %vm240_vm0, %v497_v30 }
 0x20d   : > { %v357_v47 = vpop.xlane.xlu1 %356  ;;  %v362_v48 = vpop.xlane.xlu0 %361 }
 0x20e   : > { %v498_v49 = vadd.f32 %v494_v37, %v357_v47  ;;  %v499_v50 = vadd.f32 %v495_v44, %v362_v48 }
 0x20f   : > { %v518_v51 = vld [vmem:[#allocation3 + $0x10] sm:$0xff] }
 0x210   : > { %1010 = vlog2.f32 %v518_v51  ;;  %502 = vst.msk [vmem:[#allocation4 + $0x8] sm:$0xff] %vm240_vm0, %v498_v49  ;;  %503 = vst.msk [vmem:[#allocation4 + $0x10] sm:$0xff] %vm240_vm0, %v499_v50 }
 0x211   : > { %v367_v6 = vpop.xlane.xlu1 %366 }
 0x212   : > { %v1007_v52 = vpop.eup %1006  ;;  %v500_v53 = vadd.f32 %v496_v5, %v367_v6 }
 0x213   : > { %v519_v54 = vld [vmem:[#allocation3 + $0x18] sm:$0xff]  ;;  %v521_v3 = vmul.f32 0.6931472, %v1007_v52  ;;  %v532_v55 = vld [vmem:[#allocation4] sm:$0xff] }
 0x214   : > { %1012 = vlog2.f32 %v519_v54  ;;  %504 = vst.msk [vmem:[#allocation4 + $0x18] sm:$0xff] %vm240_vm0, %v500_v53 }
 0x215   : > { %v528_v13 = vadd.f32 %v521_v3, %v512_v10 }
 0x216   : > { %v1009_v56 = vpop.eup %1008 }
 0x217   : > { %v536_v57 = vsub.f32 %v528_v13, %v532_v55  ;;  %v523_v58 = vmul.f32 0.6931472, %v1009_v56  ;;  %v533_v22 = vld [vmem:[#allocation4 + $0x8] sm:$0xff]  ;;  %v534_v17 = vld [vmem:[#allocation4 + $0x10] sm:$0xff] }
 0x219   : > { %540 = vst.msk [vmem:[%s1493_s15] sm:$0xff] %vm240_vm0, %v536_v57  ;;  %v529_v60 = vadd.f32 %v523_v58, %v513_v59 }
 0x21a   : > { %v1011_v61 = vpop.eup %1010 }
 0x21b   : > { %v537_v38 = vsub.f32 %v529_v60, %v533_v22  ;;  %v525_v63 = vmul.f32 0.6931472, %v1011_v61  ;;  %v535_v15 = vld [vmem:[#allocation4 + $0x18] sm:$0xff] }
 0x21d   : > { %541 = vst.msk [vmem:[%s1493_s15 + $0x8] sm:$0xff] %vm240_vm0, %v537_v38  ;;  %v530_v4 = vadd.f32 %v525_v63, %v514_v7 }
 0x21e   : > { %v1013_v8 = vpop.eup %1012 }
 0x21f   : > { %v538_v18 = vsub.f32 %v530_v4, %v534_v17  ;;  %v527_v9 = vmul.f32 0.6931472, %v1013_v8  ;;  %550 = sbr.rel (!%p1225_p9) target bundleno = 599 (0x257), region = 44 }
 0x221   : > { %542 = vst.msk [vmem:[%s1493_s15 + $0x10] sm:$0xff] %vm240_vm0, %v538_v18  ;;  %v531_v14 = vadd.f32 %v527_v9, %v515_v11 }
 0x223   : > { %v539_v62 = vsub.f32 %v531_v14, %v535_v15 }
 0x225   : > { %543 = vst.msk [vmem:[%s1493_s15 + $0x18] sm:$0xff] %vm240_vm0, %v539_v62 }
 0x226   : > { %s1585_s17 = smov (!%p553_p12, %s552_s17), 4 }
 0x227   : > { %s825_s25 = sshll.u32 %s1585_s17, 7 }
 0x228   : > { %p828_p7 = scmp.eq.s32.totalorder %s825_s25, 0 }
 0x229   : > { %s1516_s27 = sshrl.u32 (!%p828_p7), %s1585_s17, 2 }
 0x22a   : > { %561 = sbr.rel (%p828_p7) target bundleno = 599 (0x257), region = 48  ;;  %p829_p9 = scmp.le.s32.totalorder (!%p828_p7), %s1516_s27, 0 }
 0x231   : > { %744 = sbr.rel (%p829_p9) target bundleno = 578 (0x242), region = 133  ;;  %s1572_s12 = smov (!%p829_p9), %s1510_s24 }
 0x232   : > { %s1573_s21 = smov (!%p829_p9), %s1493_s15  ;;  %s1525_s29 = smov (!%p829_p9), 0  }
 0x233   : > { %s1138_s30 = smov (!%p829_p9), 0  }
 0x238 LB: >> { %v629_v21 = vld [vmem:[%s1132_s21] sm:$0xff]  ;;  %v631_v12 = vld [vmem:[%s1132_s21 + $0x8] sm:$0xff]  ;;  %v633_v19 = vld [vmem:[%s1132_s21 + $0x10] sm:$0xff]  ;;  %s637_s3 = sadd.s32 1, %s1136_s29  ;;  %s623_s30 = sadd.s32 1, %s1140_s30   ;;  %s1140_s30 = sphi %s1138_s30, %s623_s30   ;;  %s1136_s29 = sphi %s1525_s29, %s1574_s29   ;;  %s1132_s21 = sphi %s1573_s21, %s642_s21   ;;  %s1128_s12 = sphi %s1572_s12, %s643_s12  }
 0x239   : >> { %630 = vst [vmem:[%s1128_s12] sm:$0xff] %v629_v21  ;;  %632 = vst [vmem:[%s1128_s12 + $0x8] sm:$0xff] %v631_v12  ;;  %v635_v25 = vld [vmem:[%s1132_s21 + $0x18] sm:$0xff]  ;;  %p638_p10 = scmp.ge.s32.totalorder %s637_s3, %s1516_s27  ;;  %p622_p11 = scmp.ge.s32.totalorder %s623_s30, %s1516_s27 }
 0x23a   : >> { %634 = vst [vmem:[%s1128_s12 + $0x10] sm:$0xff] %v633_v19  ;;  %636 = vst [vmem:[%s1128_s12 + $0x18] sm:$0xff] %v635_v25 }
 0x23b   : >> { %s1587_s3 = smov (%p638_p10, %s637_s3), 0  ;;  %625 = sbr.rel (!%p622_p11) target bundleno = 568 (0x238), region = 139 }
 0x23c   : >> { %s830_s4 = sshll.u32 %s1587_s3, 5  ;;  %s1574_s29 = smov %s1587_s3 }
 0x23d   : >> { %s642_s21 = scalar_lea.vmem %s1493_s15, %s830_s4 [#allocation7]   ;;  %s643_s12 = scalar_lea.vmem %s1510_s24, %s830_s4  }
 0x242 PF: > { %s1541_s7 = sand.u32 3, %s1585_s17   ;;  %s844_s19 = sshll.u32 %s1516_s27, 5 }
 0x243   : > { %s648_s26 = scalar_lea.vmem %s1493_s15, %s844_s19 [#allocation7]   ;;  %s650_s28 = scalar_lea.vmem %s1510_s24, %s844_s19  }
 0x244   : > { %p835_p13 = scmp.le.s32.totalorder %s1541_s7, 0 }
 0x245   : > { %s1142_s5 = smov (!%p835_p13), %s650_s28   ;;  %s1146_s6 = smov (!%p835_p13), %s648_s26  }
 0x246   : > { %758 = sbr.rel (%p835_p13) target bundleno = 599 (0x257), region = 144  ;;  %s1150_s8 = smov (!%p835_p13), 0  }
 0x247   : > { %s1154_s9 = smov (!%p835_p13), 0  }
 0x24d LB: >> { %v660_v0 = vld [vmem:[%s1148_s6] sm:$0xff]  ;;  %s662_s17 = sadd.s32 1, %s1152_s8  ;;  %s654_s9 = sadd.s32 1, %s1156_s9   ;;  %s1156_s9 = sphi %s1154_s9, %s654_s9   ;;  %s1152_s8 = sphi %s1150_s8, %s1151_s8   ;;  %s1148_s6 = sphi %s1146_s6, %s667_s6   ;;  %s1144_s5 = sphi %s1142_s5, %s668_s5  }
 0x24e   : >> { %661 = vst [vmem:[%s1144_s5] sm:$0xff] %v660_v0  ;;  %p663_p0 = scmp.ge.s32.totalorder %s662_s17, %s1541_s7  ;;  %p653_p2 = scmp.ge.s32.totalorder %s654_s9, %s1541_s7 }
 0x250   : >> { %s1589_s17 = smov (%p663_p0, %s662_s17), 0  ;;  %656 = sbr.rel (!%p653_p2) target bundleno = 589 (0x24d), region = 150 }
 0x251   : >> { %s836_s15 = sshll.u32 %s1589_s17, 3  ;;  %s1151_s8 = smov %s1589_s17  }
 0x252   : >> { %s667_s6 = scalar_lea.vmem %s648_s26, %s836_s15 [#allocation7]   ;;  %s668_s5 = scalar_lea.vmem %s650_s28, %s836_s15  }
 0x257 PF: > { %s15_s14 = sadd.s32 1, %s1124_s14   ;;  %s1575_s9 = smov %s1108_s10 }
 0x258   : > { %p12_p3 = scmp.ge.s32.totalorder %s15_s14, 4   ;;  %s1576_s10 = smov %s1112_s11 }
 0x259   : > { %s1577_s11 = smov %s1223_s20  ;;  %s1578_s12 = smov %s1120_s13 }
 0x25a   : > { %s1579_s13 = smov %s1581_s16  ;;  %14 = sbr.rel (!%p12_p3) target bundleno = 4 (0x4), region = 161 }
 0x261   :  { %684 = vsyncpa [#allocation6], 1 }
 0x262   :  { %686 = vsyncpa [#allocation6 + $0x1], 1 }

</bundles_post_ra>
